<compile_context>
chip_gen: v7x
topology: tpu7x:2x2x1
jax: 0.10.0
libtpu: 0.0.40
codegen_flags: <defaults>
</compile_context>

<pallas_src>
import functools

import jax
import jax.numpy as jnp
from jax.experimental import pallas as pl
from jax.experimental.pallas import tpu as pltpu


def convblock_kernel(x_ref, w_ref, b_ref, g_ref, be_ref, mgc_ref, mcg_ref,
                     seg_ref, segt_ref, mnf_ref, mnl_ref, o_ref,
                     *, L, groups, eps):
    # x_ref   : (1, C_in_pad, TB*L)  TB batch elements folded onto the lane axis
    # w_ref   : (C_out, 3*C_in_pad)  tap-fused conv weight (matmul dtype)
    # b_ref, g_ref, be_ref : (C_out, 1)  conv bias / GN gamma / GN beta (f32)
    # mgc_ref : (groups, C_out)  one-hot channel->group map
    # mcg_ref : (C_out, groups)  one-hot group->channel map
    # seg_ref : (TB*L, TB)  one-hot lane-position->sample map (per-sample sums)
    # segt_ref: (TB, TB*L)  its transpose (per-sample broadcast back)
    # mnf_ref / mnl_ref : (1, TB*L)  0/1 masks killing wrapped k=0 / k=2 taps
    # o_ref   : (1, C_out, TB*L)
    C_out = o_ref.shape[1]

    xt = x_ref[0]                                            # (C_in_pad, TBL)
    TBL = xt.shape[1]

    # --- Conv1d(k=3, p=1): one fused matmul; taps built via roll + edge mask ---
    x_prev = pltpu.roll(xt, 1, axis=1) * mnf_ref[...]        # x[l-1]
    x_next = pltpu.roll(xt, TBL - 1, axis=1) * mnl_ref[...]  # x[l+1]
    xs = jnp.concatenate([x_prev, xt, x_next], axis=0)       # (3*C_in_pad, TBL)
    acc = jnp.dot(w_ref[...], xs,
                  preferred_element_type=jnp.float32)        # (C_out, TBL) f32

    # --- GroupNorm stats on the MXU; conv bias folded analytically ---
    seg = seg_ref[...]                                       # (TBL, TB) f32
    s = jnp.dot(acc, seg, preferred_element_type=jnp.float32)          # (C_out, TB)
    sq = jnp.dot(acc * acc, seg, preferred_element_type=jnp.float32)   # (C_out, TB)

    bias = b_ref[...]                                        # (C_out, 1) f32
    Lf = jnp.float32(L)
    row_sum = s + Lf * bias                                  # sum of (conv + b)
    row_sq = sq + 2.0 * bias * s + Lf * bias * bias          # sum of (conv + b)^2

    n = jnp.float32((C_out // groups) * L)
    g1 = jnp.dot(mgc_ref[...], row_sum, preferred_element_type=jnp.float32)
    g2 = jnp.dot(mgc_ref[...], row_sq, preferred_element_type=jnp.float32)
    mean_g = g1 / n                                          # (groups, TB)
    var_g = jnp.maximum(g2 / n - mean_g * mean_g, 0.0)       # guard cancellation
    mean_c = jnp.dot(mcg_ref[...], mean_g, preferred_element_type=jnp.float32)
    var_c = jnp.dot(mcg_ref[...], var_g, preferred_element_type=jnp.float32)

    inv_c = jax.lax.rsqrt(var_c + eps)                       # (C_out, TB)
    scale_c = g_ref[...] * inv_c
    shift_c = be_ref[...] + (bias - mean_c) * scale_c

    # Broadcast per-(channel, sample) scale/shift across each sample's L lanes
    # with tiny one-hot matmuls (keeps the big tile lane-dense, no relayout).
    segt = segt_ref[...]                                     # (TB, TBL) f32
    scale_full = jnp.dot(scale_c, segt, preferred_element_type=jnp.float32)
    shift_full = jnp.dot(shift_c, segt, preferred_element_type=jnp.float32)

    # --- single FMA over the big tile, then SiLU ---
    y = acc * scale_full + shift_full
    o_ref[0] = (y * jax.nn.sigmoid(y)).astype(o_ref.dtype)


def conv_block(x, w, b, gamma, beta, *, groups=8, eps=1e-5,
               matmul_dtype=jnp.bfloat16, batch_tile=None):
    """x: (B, C_in, L); w: (C_out, C_in, 3); b/gamma/beta: (C_out,)."""
    B, C_in, L = x.shape
    C_out = w.shape[0]
    assert w.shape == (C_out, C_in, 3)
    assert C_out % groups == 0

    out_dtype = x.dtype
    mm_bytes = jnp.dtype(matmul_dtype).itemsize
    o_bytes = jnp.dtype(out_dtype).itemsize
    sub = 8 * (4 // mm_bytes)                      # sublane pack: 8 f32, 16 bf16
    C_in_pad = ((C_in + sub - 1) // sub) * sub

    # --- conservative VMEM live-set estimate and batch-tile selection ---
    try:
        phys = pltpu.get_tpu_info().vmem_capacity_bytes
    except Exception:
        phys = 64 * 1024 * 1024                    # assume v7x if unknown
    budget = int(0.55 * phys)                      # leave compiler headroom

    def _est(tb):
        tbl = tb * L
        return (2 * C_in_pad * tbl * mm_bytes          # x block, double-buffered
                + 2 * C_out * tbl * o_bytes            # out block, double-buffered
                + 6 * C_in_pad * tbl * mm_bytes        # rolled taps + sublane concat
                + 5 * C_out * tbl * 4                  # acc, acc^2, scale/shift, y
                + 2 * tbl * tb * 4                     # segment one-hot maps
                + C_out * 3 * C_in_pad * mm_bytes)     # fused weight (resident)

    if batch_tile is not None:
        TB = int(batch_tile)
    else:
        lane_tb = 1                                # smallest TB with TB*L % 128 == 0
        while (lane_tb * L) % 128 != 0 and lane_tb < 128:
            lane_tb *= 2
        cap = max(8, min(lane_tb, 32))
        TB = 1
        while TB * 2 <= cap and _est(TB * 2) <= budget:
            TB *= 2
        TB = min(TB, max(B, 1))
        # keep >= 2 parallel grid steps so both v7x TensorCores get work
        while TB > 1 and (B + TB - 1) // TB < 2:
            TB //= 2
    TBL = TB * L
    vmem_limit = int(min(0.75 * phys, max(32 * 1024 * 1024, int(1.5 * _est(TB)))))

    B_pad = ((B + TB - 1) // TB) * TB
    nb = B_pad // TB

    # --- data prep: pad, cast matmul operands, fold TB onto the lane axis ---
    xp = x
    if B_pad != B:
        xp = jnp.pad(xp, ((0, B_pad - B), (0, 0), (0, 0)))
    if C_in_pad != C_in:
        xp = jnp.pad(xp, ((0, 0), (0, C_in_pad - C_in), (0, 0)))
    xp = xp.astype(matmul_dtype)
    x2 = xp.reshape(nb, TB, C_in_pad, L).transpose(0, 2, 1, 3).reshape(nb, C_in_pad, TBL)

    # Tap-fused weight: column block k multiplies the shifted view x[l+k-1],
    # matching the in-kernel concat order [x_prev, x, x_next].
    wp = jnp.pad(w, ((0, 0), (0, C_in_pad - C_in), (0, 0)))
    w_fused = jnp.transpose(wp, (0, 2, 1)).reshape(C_out, 3 * C_in_pad)
    w_fused = w_fused.astype(matmul_dtype)

    b2 = b.reshape(C_out, 1).astype(jnp.float32)
    g2 = gamma.reshape(C_out, 1).astype(jnp.float32)
    be2 = beta.reshape(C_out, 1).astype(jnp.float32)
    ch_group = jnp.arange(C_out) // (C_out // groups)
    m_gc = (jnp.arange(groups)[:, None] == ch_group[None, :]).astype(jnp.float32)
    m_cg = m_gc.T
    pos = jnp.arange(TBL)
    seg = (pos[:, None] // L == jnp.arange(TB)[None, :]).astype(jnp.float32)  # (TBL, TB)
    seg_t = seg.T                                                             # (TB, TBL)
    m_nf = ((pos % L) >= 1).astype(matmul_dtype).reshape(1, TBL)
    m_nl = ((pos % L) <= L - 2).astype(matmul_dtype).reshape(1, TBL)

    kern = functools.partial(convblock_kernel, L=L, groups=groups, eps=eps)
    out2 = pl.pallas_call(
        kern,
        out_shape=jax.ShapeDtypeStruct((nb, C_out, TBL), out_dtype),
        grid=(nb,),
        in_specs=[
            pl.BlockSpec((1, C_in_pad, TBL), lambda i: (i, 0, 0)),
            pl.BlockSpec((C_out, 3 * C_in_pad), lambda i: (0, 0)),
            pl.BlockSpec((C_out, 1), lambda i: (0, 0)),
            pl.BlockSpec((C_out, 1), lambda i: (0, 0)),
            pl.BlockSpec((C_out, 1), lambda i: (0, 0)),
            pl.BlockSpec((groups, C_out), lambda i: (0, 0)),
            pl.BlockSpec((C_out, groups), lambda i: (0, 0)),
            pl.BlockSpec((TBL, TB), lambda i: (0, 0)),
            pl.BlockSpec((TB, TBL), lambda i: (0, 0)),
            pl.BlockSpec((1, TBL), lambda i: (0, 0)),
            pl.BlockSpec((1, TBL), lambda i: (0, 0)),
        ],
        out_specs=pl.BlockSpec((1, C_out, TBL), lambda i: (i, 0, 0)),
        compiler_params=pltpu.CompilerParams(
            dimension_semantics=("parallel",),
            vmem_limit_bytes=vmem_limit),
    )(x2, w_fused, b2, g2, be2, m_gc, m_cg, seg, seg_t, m_nf, m_nl)

    # Unfold the lane axis back to (B, C_out, L) (wrapper layout plumbing).
    out = out2.reshape(nb, C_out, TB, L).transpose(0, 2, 1, 3).reshape(B_pad, C_out, L)
    return out[:B]


def _reference(x, w, b, gamma, beta, *, groups=8, eps=1e-5):
    """Plain-JAX reference matching PyTorch ConvBlock semantics."""
    y = jax.lax.conv_general_dilated(
        x, w, window_strides=(1,), padding=((1, 1),),
        dimension_numbers=("NCH", "OIH", "NCH"))
    y = y + b[None, :, None]
    B, C, L = y.shape
    yg = y.reshape(B, groups, (C // groups) * L)
    mean = yg.mean(axis=-1, keepdims=True)
    var = yg.var(axis=-1, keepdims=True)
    yg = (yg - mean) / jnp.sqrt(var + eps)
    y = yg.reshape(B, C, L) * gamma[None, :, None] + beta[None, :, None]
    return y * jax.nn.sigmoid(y)


if __name__ == "__main__":
    B, C_in, C_out, L, groups = 2, 4, 16, 16, 8

    key = jax.random.PRNGKey(0)
    kx, kw, kb = jax.random.split(key, 3)
    x = jax.random.normal(kx, (B, C_in, L), dtype=jnp.float32)
    # Deterministic synthetic init mimicking Conv1d's fan-in scale.
    fan_in = C_in * 3
    bound = 1.0 / (fan_in ** 0.5)
    w = jax.random.uniform(kw, (C_out, C_in, 3), jnp.float32, -bound, bound)
    b = jax.random.uniform(kb, (C_out,), jnp.float32, -bound, bound)
    gamma = jnp.ones((C_out,), jnp.float32)   # GroupNorm default affine
    beta = jnp.zeros((C_out,), jnp.float32)

    ref = _reference(x, w, b, gamma, beta, groups=groups)

    # f32 matmul operands: near-exact match with the reference.
    out_f32 = jax.block_until_ready(
        conv_block(x, w, b, gamma, beta, groups=groups, matmul_dtype=jnp.float32))
    assert out_f32.shape == (B, C_out, L)
    assert jnp.allclose(out_f32, ref, atol=1e-4, rtol=1e-4), "f32 mismatch vs reference"

    # Default bf16 matmul operands (f32 accumulate / f32 GroupNorm+SiLU):
    # GN stats see bf16-rounded conv outputs, hence the loose tolerance.
    out_bf16 = jax.block_until_ready(conv_block(x, w, b, gamma, beta, groups=groups))
    assert out_bf16.shape == (B, C_out, L)
    assert jnp.allclose(out_bf16, ref, atol=5e-2, rtol=5e-2), "bf16 mismatch vs reference"

    # Non-divisible batch (padding path) with >1 sample folded per lane slab:
    # checks the segment-boundary masking of the conv halo.
    out_pad = jax.block_until_ready(
        conv_block(jnp.concatenate([x, x[:1]], axis=0), w, b, gamma, beta,
                   groups=groups, matmul_dtype=jnp.float32, batch_tile=2))
    assert out_pad.shape == (B + 1, C_out, L)
    assert jnp.allclose(out_pad[:B], out_f32, atol=1e-4, rtol=1e-4), "batch-fold mismatch"

    print("KERNEL_OK")
</pallas_src>

<mosaic_0001>
module attributes {stable_mosaic.version = 11 : i64} {
  func.func @convblock_kernel(%arg0: i32, %arg1: memref<1x8x16xf32, #tpu.memory_space<vmem>>, %arg2: memref<16x24xf32, #tpu.memory_space<vmem>>, %arg3: memref<16x1xf32, #tpu.memory_space<vmem>>, %arg4: memref<16x1xf32, #tpu.memory_space<vmem>>, %arg5: memref<16x1xf32, #tpu.memory_space<vmem>>, %arg6: memref<8x16xf32, #tpu.memory_space<vmem>>, %arg7: memref<16x8xf32, #tpu.memory_space<vmem>>, %arg8: memref<16x1xf32, #tpu.memory_space<vmem>>, %arg9: memref<1x16xf32, #tpu.memory_space<vmem>>, %arg10: memref<1x16xf32, #tpu.memory_space<vmem>>, %arg11: memref<1x16xf32, #tpu.memory_space<vmem>>, %arg12: memref<1x16x16xf32, #tpu.memory_space<vmem>>) attributes {dimension_semantics = [#tpu.dimension_semantics<parallel>], iteration_bounds = array<i64: 2>, scalar_prefetch = 0 : i64, scratch_operands = 0 : i64, tpu.core_type = #tpu.core_type<tc>, window_params = [{transform_indices = @transform_0, window_bounds = array<i64: 1, 8, 16>}, {pipeline_mode = #tpu.pipeline_mode<synchronous>, transform_indices = @transform_1, window_bounds = array<i64: 16, 24>}, {pipeline_mode = #tpu.pipeline_mode<synchronous>, transform_indices = @transform_2, window_bounds = array<i64: 16, 1>}, {pipeline_mode = #tpu.pipeline_mode<synchronous>, transform_indices = @transform_3, window_bounds = array<i64: 16, 1>}, {pipeline_mode = #tpu.pipeline_mode<synchronous>, transform_indices = @transform_4, window_bounds = array<i64: 16, 1>}, {pipeline_mode = #tpu.pipeline_mode<synchronous>, transform_indices = @transform_5, window_bounds = array<i64: 8, 16>}, {pipeline_mode = #tpu.pipeline_mode<synchronous>, transform_indices = @transform_6, window_bounds = array<i64: 16, 8>}, {pipeline_mode = #tpu.pipeline_mode<synchronous>, transform_indices = @transform_7, window_bounds = array<i64: 16, 1>}, {pipeline_mode = #tpu.pipeline_mode<synchronous>, transform_indices = @transform_8, window_bounds = array<i64: 1, 16>}, {pipeline_mode = #tpu.pipeline_mode<synchronous>, transform_indices = @transform_9, window_bounds = array<i64: 1, 16>}, {pipeline_mode = #tpu.pipeline_mode<synchronous>, transform_indices = @transform_10, window_bounds = array<i64: 1, 16>}, {transform_indices = @transform_11, window_bounds = array<i64: 1, 16, 16>}]} {
    %c0 = arith.constant 0 : index
    %c0_0 = arith.constant 0 : index
    %c0_1 = arith.constant 0 : index
    %0 = vector.load %arg1[%c0, %c0_0, %c0_1] : memref<1x8x16xf32, #tpu.memory_space<vmem>>, vector<1x8x16xf32>
    %1 = vector.shape_cast %0 : vector<1x8x16xf32> to vector<8x16xf32>
    %c1_i32 = arith.constant 1 : i32
    %2 = tpu.dynamic_rotate %1 by %c1_i32 dim 1 : vector<8x16xf32>, i32 -> vector<8x16xf32>
    %c0_2 = arith.constant 0 : index
    %c0_3 = arith.constant 0 : index
    %3 = vector.load %arg10[%c0_2, %c0_3] : memref<1x16xf32, #tpu.memory_space<vmem>>, vector<1x16xf32>
    %4 = vector.broadcast %3 : vector<1x16xf32> to vector<8x16xf32>
    %5 = arith.mulf %2, %4 : vector<8x16xf32>
    %c15_i32 = arith.constant 15 : i32
    %6 = tpu.dynamic_rotate %1 by %c15_i32 dim 1 : vector<8x16xf32>, i32 -> vector<8x16xf32>
    %c0_4 = arith.constant 0 : index
    %c0_5 = arith.constant 0 : index
    %7 = vector.load %arg11[%c0_4, %c0_5] : memref<1x16xf32, #tpu.memory_space<vmem>>, vector<1x16xf32>
    %8 = vector.broadcast %7 : vector<1x16xf32> to vector<8x16xf32>
    %9 = arith.mulf %6, %8 : vector<8x16xf32>
    %10 = tpu.concatenate %5, %1, %9 in 0 : vector<8x16xf32>, vector<8x16xf32>, vector<8x16xf32> -> vector<24x16xf32>
    %c0_6 = arith.constant 0 : index
    %c0_7 = arith.constant 0 : index
    %11 = vector.load %arg2[%c0_6, %c0_7] : memref<16x24xf32, #tpu.memory_space<vmem>>, vector<16x24xf32>
    %cst = arith.constant dense<0.000000e+00> : vector<16x16xf32>
    %12 = tpu.matmul %11, %10, %cst {dimension_numbers = #tpu.dot_dimension_numbers<[1], [0], [0], [1], [0, 0, 1, 1], [], []>} : vector<16x24xf32>, vector<24x16xf32>, vector<16x16xf32> -> vector<16x16xf32>
    %c0_8 = arith.constant 0 : index
    %c0_9 = arith.constant 0 : index
    %13 = vector.load %arg8[%c0_8, %c0_9] : memref<16x1xf32, #tpu.memory_space<vmem>>, vector<16x1xf32>
    %cst_10 = arith.constant dense<0.000000e+00> : vector<16x1xf32>
    %14 = tpu.matmul %12, %13, %cst_10 {dimension_numbers = #tpu.dot_dimension_numbers<[1], [0], [0], [1], [0, 0, 1, 1], [], []>} : vector<16x16xf32>, vector<16x1xf32>, vector<16x1xf32> -> vector<16x1xf32>
    %15 = arith.mulf %12, %12 : vector<16x16xf32>
    %cst_11 = arith.constant dense<0.000000e+00> : vector<16x1xf32>
    %16 = tpu.matmul %15, %13, %cst_11 {dimension_numbers = #tpu.dot_dimension_numbers<[1], [0], [0], [1], [0, 0, 1, 1], [], []>} : vector<16x16xf32>, vector<16x1xf32>, vector<16x1xf32> -> vector<16x1xf32>
    %c0_12 = arith.constant 0 : index
    %c0_13 = arith.constant 0 : index
    %17 = vector.load %arg3[%c0_12, %c0_13] : memref<16x1xf32, #tpu.memory_space<vmem>>, vector<16x1xf32>
    %cst_14 = arith.constant 1.600000e+01 : f32
    %18 = vector.broadcast %cst_14 : f32 to vector<16x1xf32>
    %19 = arith.mulf %18, %17 : vector<16x1xf32>
    %20 = arith.addf %14, %19 : vector<16x1xf32>
    %cst_15 = arith.constant 2.000000e+00 : f32
    %21 = vector.broadcast %cst_15 : f32 to vector<16x1xf32>
    %22 = arith.mulf %21, %17 : vector<16x1xf32>
    %23 = arith.mulf %22, %14 : vector<16x1xf32>
    %24 = arith.addf %16, %23 : vector<16x1xf32>
    %cst_16 = arith.constant 1.600000e+01 : f32
    %25 = vector.broadcast %cst_16 : f32 to vector<16x1xf32>
    %26 = arith.mulf %25, %17 : vector<16x1xf32>
    %27 = arith.mulf %26, %17 : vector<16x1xf32>
    %28 = arith.addf %24, %27 : vector<16x1xf32>
    %c0_17 = arith.constant 0 : index
    %c0_18 = arith.constant 0 : index
    %29 = vector.load %arg6[%c0_17, %c0_18] : memref<8x16xf32, #tpu.memory_space<vmem>>, vector<8x16xf32>
    %cst_19 = arith.constant dense<0.000000e+00> : vector<8x1xf32>
    %30 = tpu.matmul %29, %20, %cst_19 {dimension_numbers = #tpu.dot_dimension_numbers<[1], [0], [0], [1], [0, 0, 1, 1], [], []>} : vector<8x16xf32>, vector<16x1xf32>, vector<8x1xf32> -> vector<8x1xf32>
    %c0_20 = arith.constant 0 : index
    %c0_21 = arith.constant 0 : index
    %31 = vector.load %arg6[%c0_20, %c0_21] : memref<8x16xf32, #tpu.memory_space<vmem>>, vector<8x16xf32>
    %cst_22 = arith.constant dense<0.000000e+00> : vector<8x1xf32>
    %32 = tpu.matmul %31, %28, %cst_22 {dimension_numbers = #tpu.dot_dimension_numbers<[1], [0], [0], [1], [0, 0, 1, 1], [], []>} : vector<8x16xf32>, vector<16x1xf32>, vector<8x1xf32> -> vector<8x1xf32>
    %cst_23 = arith.constant 3.200000e+01 : f32
    %33 = vector.broadcast %cst_23 : f32 to vector<8x1xf32>
    %34 = arith.divf %30, %33 : vector<8x1xf32>
    %cst_24 = arith.constant 3.200000e+01 : f32
    %35 = vector.broadcast %cst_24 : f32 to vector<8x1xf32>
    %36 = arith.divf %32, %35 : vector<8x1xf32>
    %37 = arith.mulf %34, %34 : vector<8x1xf32>
    %38 = arith.subf %36, %37 : vector<8x1xf32>
    %cst_25 = arith.constant 0.000000e+00 : f32
    %39 = vector.broadcast %cst_25 : f32 to vector<8x1xf32>
    %40 = arith.maximumf %38, %39 : vector<8x1xf32>
    %c0_26 = arith.constant 0 : index
    %c0_27 = arith.constant 0 : index
    %41 = vector.load %arg7[%c0_26, %c0_27] : memref<16x8xf32, #tpu.memory_space<vmem>>, vector<16x8xf32>
    %cst_28 = arith.constant dense<0.000000e+00> : vector<16x1xf32>
    %42 = tpu.matmul %41, %34, %cst_28 {dimension_numbers = #tpu.dot_dimension_numbers<[1], [0], [0], [1], [0, 0, 1, 1], [], []>} : vector<16x8xf32>, vector<8x1xf32>, vector<16x1xf32> -> vector<16x1xf32>
    %c0_29 = arith.constant 0 : index
    %c0_30 = arith.constant 0 : index
    %43 = vector.load %arg7[%c0_29, %c0_30] : memref<16x8xf32, #tpu.memory_space<vmem>>, vector<16x8xf32>
    %cst_31 = arith.constant dense<0.000000e+00> : vector<16x1xf32>
    %44 = tpu.matmul %43, %40, %cst_31 {dimension_numbers = #tpu.dot_dimension_numbers<[1], [0], [0], [1], [0, 0, 1, 1], [], []>} : vector<16x8xf32>, vector<8x1xf32>, vector<16x1xf32> -> vector<16x1xf32>
    %cst_32 = arith.constant 9.99999974E-6 : f32
    %45 = vector.broadcast %cst_32 : f32 to vector<16x1xf32>
    %46 = arith.addf %44, %45 : vector<16x1xf32>
    %47 = math.rsqrt %46 : vector<16x1xf32>
    %c0_33 = arith.constant 0 : index
    %c0_34 = arith.constant 0 : index
    %48 = vector.load %arg4[%c0_33, %c0_34] : memref<16x1xf32, #tpu.memory_space<vmem>>, vector<16x1xf32>
    %49 = arith.mulf %48, %47 : vector<16x1xf32>
    %c0_35 = arith.constant 0 : index
    %c0_36 = arith.constant 0 : index
    %50 = vector.load %arg5[%c0_35, %c0_36] : memref<16x1xf32, #tpu.memory_space<vmem>>, vector<16x1xf32>
    %51 = arith.subf %17, %42 : vector<16x1xf32>
    %52 = arith.mulf %51, %49 : vector<16x1xf32>
    %53 = arith.addf %50, %52 : vector<16x1xf32>
    %c0_37 = arith.constant 0 : index
    %c0_38 = arith.constant 0 : index
    %54 = vector.load %arg9[%c0_37, %c0_38] : memref<1x16xf32, #tpu.memory_space<vmem>>, vector<1x16xf32>
    %cst_39 = arith.constant dense<0.000000e+00> : vector<16x16xf32>
    %55 = tpu.matmul %49, %54, %cst_39 {dimension_numbers = #tpu.dot_dimension_numbers<[1], [0], [0], [1], [0, 0, 1, 1], [], []>} : vector<16x1xf32>, vector<1x16xf32>, vector<16x16xf32> -> vector<16x16xf32>
    %cst_40 = arith.constant dense<0.000000e+00> : vector<16x16xf32>
    %56 = tpu.matmul %53, %54, %cst_40 {dimension_numbers = #tpu.dot_dimension_numbers<[1], [0], [0], [1], [0, 0, 1, 1], [], []>} : vector<16x1xf32>, vector<1x16xf32>, vector<16x16xf32> -> vector<16x16xf32>
    %57 = arith.mulf %12, %55 : vector<16x16xf32>
    %58 = arith.addf %57, %56 : vector<16x16xf32>
    %59 = arith.negf %58 : vector<16x16xf32>
    %60 = math.exp %59 : vector<16x16xf32>
    %cst_41 = arith.constant 1.000000e+00 : f32
    %61 = vector.broadcast %cst_41 : f32 to vector<16x16xf32>
    %62 = arith.addf %61, %60 : vector<16x16xf32>
    %63 = arith.divf %61, %62 : vector<16x16xf32>
    %64 = arith.mulf %58, %63 : vector<16x16xf32>
    %c0_42 = arith.constant 0 : index
    %c0_43 = arith.constant 0 : index
    %c0_44 = arith.constant 0 : index
    %65 = vector.load %arg12[%c0_42, %c0_43, %c0_44] : memref<1x16x16xf32, #tpu.memory_space<vmem>>, vector<1x16x16xf32>
    %66 = vector.shape_cast %65 : vector<1x16x16xf32> to vector<16x16xf32>
    %67 = vector.shape_cast %64 : vector<16x16xf32> to vector<1x16x16xf32>
    tpu.vector_store %arg12[%c0_42, %c0_43, %c0_44], %67 {strides = array<i32>} : memref<1x16x16xf32, #tpu.memory_space<vmem>>, vector<1x16x16xf32>,
    return
  }
  func.func @transform_0(%arg0: i32) -> (i32, i32, i32) {
    %c0_i32 = arith.constant 0 : i32
    %c0_i32_0 = arith.constant 0 : i32
    %c0_i32_1 = arith.constant 0 : i32
    return %arg0, %c0_i32, %c0_i32_0 : i32, i32, i32
  }
  func.func @transform_1(%arg0: i32) -> (i32, i32) {
    %c0_i32 = arith.constant 0 : i32
    %c0_i32_0 = arith.constant 0 : i32
    %c0_i32_1 = arith.constant 0 : i32
    return %c0_i32, %c0_i32_0 : i32, i32
  }
  func.func @transform_2(%arg0: i32) -> (i32, i32) {
    %c0_i32 = arith.constant 0 : i32
    %c0_i32_0 = arith.constant 0 : i32
    %c0_i32_1 = arith.constant 0 : i32
    return %c0_i32, %c0_i32_0 : i32, i32
  }
  func.func @transform_3(%arg0: i32) -> (i32, i32) {
    %c0_i32 = arith.constant 0 : i32
    %c0_i32_0 = arith.constant 0 : i32
    %c0_i32_1 = arith.constant 0 : i32
    return %c0_i32, %c0_i32_0 : i32, i32
  }
  func.func @transform_4(%arg0: i32) -> (i32, i32) {
    %c0_i32 = arith.constant 0 : i32
    %c0_i32_0 = arith.constant 0 : i32
    %c0_i32_1 = arith.constant 0 : i32
    return %c0_i32, %c0_i32_0 : i32, i32
  }
  func.func @transform_5(%arg0: i32) -> (i32, i32) {
    %c0_i32 = arith.constant 0 : i32
    %c0_i32_0 = arith.constant 0 : i32
    %c0_i32_1 = arith.constant 0 : i32
    return %c0_i32, %c0_i32_0 : i32, i32
  }
  func.func @transform_6(%arg0: i32) -> (i32, i32) {
    %c0_i32 = arith.constant 0 : i32
    %c0_i32_0 = arith.constant 0 : i32
    %c0_i32_1 = arith.constant 0 : i32
    return %c0_i32, %c0_i32_0 : i32, i32
  }
  func.func @transform_7(%arg0: i32) -> (i32, i32) {
    %c0_i32 = arith.constant 0 : i32
    %c0_i32_0 = arith.constant 0 : i32
    %c0_i32_1 = arith.constant 0 : i32
    return %c0_i32, %c0_i32_0 : i32, i32
  }
  func.func @transform_8(%arg0: i32) -> (i32, i32) {
    %c0_i32 = arith.constant 0 : i32
    %c0_i32_0 = arith.constant 0 : i32
    %c0_i32_1 = arith.constant 0 : i32
    return %c0_i32, %c0_i32_0 : i32, i32
  }
  func.func @transform_9(%arg0: i32) -> (i32, i32) {
    %c0_i32 = arith.constant 0 : i32
    %c0_i32_0 = arith.constant 0 : i32
    %c0_i32_1 = arith.constant 0 : i32
    return %c0_i32, %c0_i32_0 : i32, i32
  }
  func.func @transform_10(%arg0: i32) -> (i32, i32) {
    %c0_i32 = arith.constant 0 : i32
    %c0_i32_0 = arith.constant 0 : i32
    %c0_i32_1 = arith.constant 0 : i32
    return %c0_i32, %c0_i32_0 : i32, i32
  }
  func.func @transform_11(%arg0: i32) -> (i32, i32, i32) {
    %c0_i32 = arith.constant 0 : i32
    %c0_i32_0 = arith.constant 0 : i32
    %c0_i32_1 = arith.constant 0 : i32
    return %arg0, %c0_i32, %c0_i32_0 : i32, i32, i32
  }
}

</mosaic_0001>

<bundles_post_ra>
// kernel: tpu_custom_call.1
= control target key start
LH: loop header
LB: loop body
LE: loop exit
PB: predicated region body
PF: predicated region fallthrough
CT: control target
= control target key end

     0   :  { %16 = vsyncpa [#allocation3], 0  ;;  %s1808_s0 = inlined_call_operand.vmem [shape: f32[2,8,16], index: 0, kind: input, shape index: {}]   ;;  %s1809_s1 = inlined_call_operand.vmem [shape: f32[16,24], index: 1, kind: input, shape index: {}]   ;;  %s1810_s2 = inlined_call_operand.vmem [shape: f32[16,1], index: 2, kind: input, shape index: {}]   ;;  %s1811_s3 = inlined_call_operand.vmem [shape: f32[16,1], index: 3, kind: input, shape index: {}]   ;;  %s1812_s4 = inlined_call_operand.vmem [shape: f32[16,1], index: 4, kind: input, shape index: {}]   ;;  %s1813_s5 = inlined_call_operand.vmem [shape: f32[8,16], index: 5, kind: input, shape index: {}]   ;;  %s1814_s6 = inlined_call_operand.vmem [shape: f32[16,8], index: 6, kind: input, shape index: {}]   ;;  %s1815_s7 = inlined_call_operand.vmem [shape: f32[16,1], index: 7, kind: input, shape index: {}]   ;;  %s1816_s8 = inlined_call_operand.vmem [shape: f32[1,16], index: 8, kind: input, shape index: {}]   ;;  %s1817_s9 = inlined_call_operand.vmem [shape: f32[1,16], index: 9, kind: input, shape index: {}]   ;;  %s1818_s10 = inlined_call_operand.vmem [shape: f32[1,16], index: 10, kind: input, shape index: {}]   ;;  %s1819_s11 = inlined_call_operand.hbm [shape: f32[2,16,16], index: 11, kind: output, shape index: {}]  }
   0x1   :  { %18 = vsyncpa [#allocation3 + $0x1], 0  ;;  %s1619_s17 = smov 0   ;;  %s1621_s18 = smov 0  }
   0x2   :  { %s1623_s19 = smov 0   ;;  %s1625_s20 = smov 0  }
   0x3 LB: > { %1821 = sst [smem:[#allocation5_spill]] %s1542_s19  ;;  %s1640_s21 = sadd.s32 4294967295, %s1546_s20   ;;  %s1546_s20 = sphi %s1625_s20, %s1829_s20   ;;  %s1542_s19 = sphi %s1623_s19, %s1826_s19   ;;  %s1538_s18 = sphi %s1621_s18, %s1828_s18   ;;  %s1534_s17 = sphi %s1619_s17, %s1827_s17  }
   0x4   : > { %s1278_s22 = sadd.s32 4294967294, %s1546_s20   ;;  %s1644_s23 = sadd.s32 1, %s1546_s20  }
   0x5   : > { %s267_s24 = sadd.s32 1, %s1542_s19  ;;  %s264_s25 = ssub.s32 %s1546_s20, %s1644_s23 }
   0x6   : > { %p277_p0 = scmp.ne.s32.totalorder %s1542_s19, %s1538_s18  ;;  %p265_p1 = scmp.eq.s32.totalorder %s264_s25, 0 }
   0x7   : > { %p278_p2 = scmp.eq.s32.totalorder %s1640_s21, 1  ;;  %p283_p3 = scmp.ne.s32.totalorder %s1538_s18, %s1534_s17 }
   0x8   : > { %p284_p4 = scmp.eq.s32.totalorder %s1278_s22, 1  ;;  %p1281_p7 = scmp.ge.s32.totalorder %s1546_s20, 1 }
   0x9   : > { %s1655_s26 = scalar_select %p265_p1, %s1542_s19, %s267_s24  }
   0xa   : > { %p1657_p5 = por %p278_p2, %p277_p0  ;;  %p1661_p6 = por %p284_p4, %p283_p3 }
   0xb   : > { %1822 = sst [smem:[#allocation6_spill]] %s1655_s26  ;;  %p339_p8 = scmp.lt.s32.totalorder %s1546_s20, 3 }
   0xd   : > { %p340_p9 = pnand %p1281_p7, %p339_p8 }
   0xe   : > { %p378_p10 = scmp.lt.s32.totalorder (!%p340_p9), %s1640_s21, 1  ;;  %v1285_v0 = vld [vmem:[%s1818_s10] ss:$0 sm:$0xff] (!%p340_p9)  ;;  %s1548_s13 = smov (!%p340_p9), 1   ;;  %vm383_vm0 = vcmask (!%p340_p9), 1047680   ;;  %vm428_vm1 = vcmask (!%p340_p9), 195584  }
   0xf   : > { %343 = sbr.rel (%p340_p9) target bundleno = 1644 (0x66c), region = 64  ;;  %406 = vrot.lane.b32.xlu1 (!%p340_p9), %v1285_v0, %s1548_s13  ;;  %v1284_v1 = vld [vmem:[%s1817_s9] ss:$0 sm:$0xff] (!%p340_p9)  ;;  %s1549_s26 = smov (!%p340_p9), 15   ;;  %v511_v15 = vld [vmem:[%s1815_s7 + $0x8] sm:$0xff] (!%p340_p9)  ;;  %vm512_vm2 = vcmask (!%p340_p9), 130048  }
  0x10   : > { %s1550_s19 = smov (!%p340_p9), 16   ;;  %s1551_s29 = smov (!%p340_p9), 14   ;;  %v416_v13 = vld [vmem:[%s1809_s1] sm:$0xff] (!%p340_p9)  ;;  %v417_v23 = vld [vmem:[%s1809_s1 + $0x8] sm:$0xff] (!%p340_p9)  ;;  %v1553_v28 = vmov (!%p340_p9), 0.0|0.0   ;;  %vm1554_vm3 = vmmov (!%p340_p9), 0  }
  0x11   : > { %s1552_s30 = smov (!%p340_p9), 113   ;;  %1349 = vmatprep.mubr.msk.f32.mxu0 (!%p340_p9), %vm428_vm1, %v416_v13  ;;  %v510_v14 = vld [vmem:[%s1815_s7] sm:$0xff] (!%p340_p9)  ;;  %v1555_v29 = vmov (!%p340_p9), 0.0   ;;  %v1709_v30 = vld [vmem:[%s1810_s2 + $0x8] sm:$0xff] (!%p340_p9)  ;;  %vm843_vm4 = vcmask (!%p340_p9), 64512   ;;  %vm1022_vm5 = vcmask (!%p340_p9), 1040384  }
  0x12   : > { %v1404_v16 = vpack.c.bf16 (!%p340_p9), %v511_v15, %v510_v14  ;;  %v1714_v31 = vld [vmem:[%s1810_s2] sm:$0xff] (!%p340_p9)  ;;  %v599_v32 = vmul.f32 (!%p340_p9), 16.0, %v1709_v30  ;;  %v603_v34 = vmul.f32 (!%p340_p9), 2.0, %v1709_v30  ;;  %v842_v57 = vld [vmem:[%s1814_s6 + $0x8] sm:$0xff] (!%p340_p9)  ;;  %vm1015_vm6 = vcmask (!%p340_p9), 7168   ;;  %s375_s14 = sand.u32 (!%p340_p9), 1, %s1538_s18  }
  0x13   : > { %396 = vrot.lane.b32.xlu1 (!%p340_p9), %v1284_v1, %s1549_s26  ;;  %v598_v33 = vmul.f32 (!%p340_p9), 16.0, %v1714_v31  ;;  %v602_v36 = vmul.f32 (!%p340_p9), 2.0, %v1714_v31  ;;  %v691_v49 = vld [vmem:[%s1813_s5] sm:$0xff] (!%p340_p9)  ;;  %s1282_s15 = sshll.u32 (!%p340_p9), %s375_s14, 4  ;;  %s1311_s24 = sshll.u32 (!%p340_p9), %s1640_s21, 8 }
  0x14   : > { %1405 = vmatprep.subr.bf16.mxu1 (!%p340_p9), %v1404_v16  ;;  %v688_v41 = vmul.f32 (!%p340_p9), %v599_v32, %v1709_v30  ;;  %v841_v53 = vld [vmem:[%s1814_s6] sm:$0xff] (!%p340_p9)  ;;  %s1556_s13 = smov (!%p340_p9), [#allocation2]  }
  0x15   : > { %1407 = vmatpush3.bf16.msra.mxu1 (!%p340_p9), %v1404_v16  ;;  %v687_v45 = vmul.f32 (!%p340_p9), %v598_v33, %v1714_v31  ;;  %v1014_v0 = vld [vmem:[%s1816_s8] sm:$0x1] (!%p340_p9) }
  0x16   : > { %s379_s12 = scalar_select %p378_p10, %s1640_s21, 1  ;;  %1409 = vmatprep.subr.bf16.mxu1 %v1404_v16 }
  0x18   : > { %s1283_s16 = sshll.u32 %s379_s12, 3  ;;  %s1767_s12 = scalar_lea.sflag [#allocation3], %s375_s14 }
  0x19   : > { %s381_s25 = scalar_lea.vmem %s1808_s0, %s1283_s16  ;;  %s377_s16 = scalar_lea.vmem [#allocation2], %s1282_s15 }
  0x1a   : > { %v382_v2 = vld [vmem:[%s381_s25] sm:$0xff]  ;;  %s1216_s22 = sshll.u32 %s377_s16, 4  ;;  %s1763_s22 = int_to_ptr.vmem [resolvable:$true] %s1216_s22 }
  0x1b   : > { %384 = vrot.lane.b32.xlu0 %v382_v2, %s1550_s19  ;;  %s1484_s21 = scalar_lea.vmem %s1763_s22, 256 }
  0x1c   : > { %p1485_p11 = scmp.ne.s32.totalorder %s1763_s22, %s1484_s21 }
  0x1e   : > { %p1486_p12 = pnand %p1485_p11, %p1657_p5 }
  0x20   : > { %p1487_p13 = pneg %p1486_p12 }
  0x81   : > { %v407_v5 = vpop.permute.xlu1 %406 }
  0x85   : > { %v397_v6 = vpop.permute.xlu1 %396 }
  0x8d   : > { %v385_v3 = vpop.permute.xlu0 %384 }
  0x8e   : > { %v386_v4 = vsel %vm383_vm0, %v385_v3, %v382_v2 }
  0x8f   : > { %387 = vrot.lane.b32.xlu0 %v386_v4, %s1550_s19  ;;  %s1488_s19 = sshll.u32 %s1556_s13, 4  ;;  %s1489_s19 = int_to_ptr.vmem [resolvable:$false] %s1488_s19 }
  0x90   : > { %p1491_p0 = scmp.lt.s32.totalorder %s1763_s22, %s1489_s19 }
  0x93   : > { %411 = vrot.lane.b32.xlu0 %v382_v2, %s1549_s26  ;;  %s1490_s26 = scalar_lea.vmem %s1489_s19, 512 }
  0x94   : > { %p1492_p1 = scmp.lt.s32.totalorder %s1490_s26, %s1484_s21 }
  0x96   : > { %p1493_p2 = por %p1492_p1, %p1491_p0 }
  0x98   : > { %p1494_p3 = pnand %p1493_p2, %p1487_p13 }
 0x101   : > { %v388_v7 = vpop.permute.xlu0 %387 }
 0x102   : > { %v389_v8 = vsel %vm383_vm0, %v388_v7, %v382_v2  ;;  %v1003_v7 = vld [vmem:[%s1811_s3 + $0x8] sm:$0xff] }
 0x103   : > { %v399_v9 = vmul.f32 %v397_v6, %v389_v8  ;;  %v409_v10 = vmul.f32 %v407_v5, %v389_v8 }
 0x105   : > { %414 = vrot.lane.b32.xlu1 %v409_v10, %s1551_s29  ;;  %v412_v11 = vpop.permute.xlu0 %411 }
 0x106   : > { %v1467_v12 = vpack.i.bf16 %v412_v11, %v399_v9  ;;  %v1002_v9 = vld [vmem:[%s1811_s3] sm:$0xff] }
 0x108   : > { %1468 = vrot.lane.b32.xlu0 %v1467_v12, %s1552_s30 }
 0x177   : > { %v415_v17 = vpop.permute.xlu1 %414 }
 0x178   : > { %423 = vrot.lane.b32.xlu1 %v415_v17, %s1552_s30  ;;  %v1007_v17 = vld [vmem:[%s1812_s4 + $0x8] sm:$0xff]  ;;  %s1761_s30 = scalar_lea.hbm %s1819_s11, %s1311_s24 }
 0x17a   : > { %v1469_v18 = vpop.permute.xlu0 %1468 }
 0x17b   : > { %v1471_v19 = vunpack.i.h.bf16 %v1469_v18  ;;  %v1470_v20 = vunpack.i.l.bf16 %v1469_v18 }
 0x17d   : > { %v1400_v21 = vpack.c.bf16 %v1471_v19, %v1470_v20 }
 0x17f   : > { %1401 = vmatprep.subr.bf16.mxu0 %v1400_v21 }
 0x180   : > { %1403 = vmatpush3.bf16.msra.mxu0 %v1400_v21 }
 0x1ea   : > { %v424_v22 = vpop.permute.xlu1 %423 }
 0x1eb   : > { %1347 = vmatprep.subr.mxu0 %v424_v22 }
 0x1ec   : > { %1348 = vmatpush3.msra.mxu0 %v424_v22 }
 0x1ed   : > { %1350 = vmatmul.mubr.msk.f32.vlgmr.msra.gmra.mrb[0].mxu0 %vm428_vm1, %v417_v23  ;;  %1412 = vmatprep.subr.bf16.mxu0 %v1553_v28 }
 0x1ee   : > { %1370 = vmatprep.mubr.msk.f32.mxu0 %vm1554_vm3, %v1555_v29 }
 0x2c0   : > { %v1692_v24 = vpop.f32.mrb[0].mxu0 }
 0x2c1   : > { %v1694_v25 = vpop.f32.mrb[1].mxu0  ;;  %v595_v27 = vmul.f32 %v1692_v24, %v1692_v24 }
 0x2c2   : > { %v594_v26 = vmul.f32 %v1694_v25, %v1694_v25  ;;  %1356 = vmatprep.mubr.msk.f32.mxu1 %vm512_vm2, %v1694_v25 }
 0x2c3   : > { %1357 = vmatmul.mubr.msk.f32.vlgmr.msra.gmra.mrb[0].mxu1 %vm512_vm2, %v1692_v24 }
 0x2c4   : > { %1411 = vmatpush3.bf16.msra.mxu1 %v1404_v16  ;;  %1363 = vmatprep.mubr.msk.f32.mxu1 %vm512_vm2, %v594_v26  ;;  %v1006_v16 = vld [vmem:[%s1812_s4] sm:$0xff] }
 0x2c5   : > { %1415 = vmatprep.subr.bf16.mxu1 %v1553_v28 }
 0x2c7   : > { %1364 = vmatmul.mubr.msk.f32.vlgmr.msra.gmra.mrb[2].mxu1 %vm512_vm2, %v595_v27 }
 0x2c8   : > { %1377 = vmatprep.mubr.msk.f32.mxu1 %vm1554_vm3, %v1555_v29 }
 0x396   : > { %v1358_v35 = vpop.f32.mrb[0].mxu1 }
 0x397   : > { %v601_v37 = vadd.f32 %v1358_v35, %v599_v32  ;;  %v585_v38 = vpop.f32.mrb[1].mxu1  ;;  %v605_v40 = vmul.f32 %v1358_v35, %v603_v34 }
 0x398   : > { %v600_v39 = vadd.f32 %v598_v33, %v585_v38  ;;  %v604_v42 = vmul.f32 %v602_v36, %v585_v38 }
 0x39a   : > { %v1413_v43 = vpack.c.bf16 %v601_v37, %v600_v39  ;;  %v1365_v44 = vpop.f32.mrb[2].mxu1 }
 0x39b   : > { %v684_v46 = vadd.f32 %v1365_v44, %v605_v40  ;;  %v678_v47 = vpop.f32.mrb[3].mxu1 }
 0x39c   : > { %v679_v48 = vadd.f32 %v678_v47, %v604_v42  ;;  %1414 = vmatpush3.bf16.msra.mxu0 %v1413_v43 }
 0x39d   : > { %v690_v50 = vadd.f32 %v688_v41, %v684_v46 }
 0x39e   : > { %v689_v51 = vadd.f32 %v687_v45, %v679_v48 }
 0x39f   : > { %1371 = vmatmul.mubr.msk.f32.vlgmr.msra.gmra.mrb[2].mxu0 %vm512_vm2, %v691_v49 }
 0x3a0   : > { %v1416_v52 = vpack.c.bf16 %v690_v50, %v689_v51  ;;  %1382 = vmatprep.mubr.msk.f32.mxu0 %vm843_vm4, %v841_v53 }
 0x3a2   : > { %1417 = vmatpush3.bf16.msra.mxu1 %v1416_v52 }
 0x3a5   : > { %1378 = vmatmul.mubr.msk.f32.vlgmr.msra.gmra.mrb[4].mxu1 %vm512_vm2, %v691_v49 }
 0x3a6   : > { %1387 = vmatprep.mubr.msk.f32.mxu1 %vm843_vm4, %v841_v53 }
 0x472   : > { %v761_v54 = vpop.f32.mrb[2].mxu0 }
 0x473   : > { %v836_v55 = vmul.f32 0.03125, %v761_v54  ;;  %v1372_v56 = vpop.f32.mrb[3].mxu0 }
 0x475   : > { %1380 = vmatprep.subr.mxu0 %v836_v55  ;;  %v838_v58 = vmul.f32 %v836_v55, %v836_v55 }
 0x476   : > { %1381 = vmatpush3.msra.mxu0 %v836_v55 }
 0x477   : > { %1383 = vmatmul.mubr.msk.f32.vlgmr.msra.gmra.mrb[4].mxu0 %vm843_vm4, %v842_v57  ;;  %1390 = vmatprep.subr.msk.mxu0 %vm1022_vm5, %v1014_v0 }
 0x478   : > { %v831_v59 = vpop.f32.mrb[4].mxu1  ;;  %1391 = vmatpush3.msk.msra.mxu0 %vm1022_vm5, %v1014_v0 }
 0x479   : > { %v837_v60 = vmul.f32 0.03125, %v831_v59  ;;  %v1379_v61 = vpop.f32.mrb[5].mxu1 }
 0x47b   : > { %v839_v62 = vsub.f32 %v837_v60, %v838_v58 }
 0x47d   : > { %v840_v63 = vmax.f32 %v839_v62, 0.0 }
 0x47f   : > { %1385 = vmatprep.subr.mxu1 %v840_v63 }
 0x480   : > { %1386 = vmatpush3.msra.mxu1 %v840_v63 }
 0x481   : > { %1388 = vmatmul.mubr.msk.f32.vlgmr.msra.gmra.mrb[6].mxu1 %vm843_vm4, %v842_v57  ;;  %1395 = vmatprep.subr.msk.mxu1 %vm1022_vm5, %v1014_v0 }
 0x482   : > { %1396 = vmatpush3.msk.msra.mxu1 %vm1022_vm5, %v1014_v0 }
 0x54a   : > { %v1384_v1 = vpop.f32.mrb[4].mxu0 }
 0x54b   : > { %v916_v2 = vpop.f32.mrb[5].mxu0  ;;  %v1009_v8 = vsub.f32 %v1709_v30, %v1384_v1 }
 0x54c   : > { %v1008_v11 = vsub.f32 %v1714_v31, %v916_v2 }
 0x554   : > { %v1389_v3 = vpop.f32.mrb[6].mxu1 }
 0x555   : > { %v997_v4 = vadd.f32 1e-05, %v1389_v3  ;;  %v991_v5 = vpop.f32.mrb[7].mxu1 }
 0x556   : > { %v992_v6 = vadd.f32 1e-05, %v991_v5 }
 0x557   : > { %1472 = vrsqrt.f32 %v997_v4 }
 0x558   : > { %1474 = vrsqrt.f32 %v992_v6 }
 0x561   : > { %v1473_v10 = vpop.eup %1472 }
 0x562   : > { %v1475_v12 = vpop.eup %1474  ;;  %v1005_v13 = vmul.f32 %v1473_v10, %v1003_v7 }
 0x563   : > { %v1004_v14 = vmul.f32 %v1475_v12, %v1002_v9 }
 0x564   : > { %v1011_v15 = vmul.f32 %v1009_v8, %v1005_v13 }
 0x565   : > { %v1010_v18 = vmul.f32 %v1008_v11, %v1004_v14  ;;  %1392 = vmatprep.mubr.msk.f32.mxu0 %vm1015_vm6, %v1004_v14 }
 0x566   : > { %1393 = vmatmul.mubr.msk.f32.vlgmr.msra.gmra.mrb[6].mxu0 %vm1015_vm6, %v1005_v13  ;;  %v1013_v20 = vadd.f32 %v1011_v15, %v1007_v17 }
 0x567   : > { %v1012_v19 = vadd.f32 %v1010_v18, %v1006_v16 }
 0x569   : > { %1397 = vmatprep.mubr.msk.f32.mxu1 %vm1015_vm6, %v1012_v19 }
 0x56a   : > { %1398 = vmatmul.mubr.msk.f32.vlgmr.msra.gmra.mrb[8].mxu1 %vm1015_vm6, %v1013_v20 }
 0x639   : > { %v1394_v21 = vpop.f32.mrb[6].mxu0 }
 0x63a   : > { %v1183_v22 = vmul.f32 %v1394_v21, %v1692_v24  ;;  %v1092_v23 = vpop.f32.mrb[7].mxu0 }
 0x63b   : > { %v1182_v26 = vmul.f32 %v1092_v23, %v1694_v25 }
 0x63d   : > { %v1399_v27 = vpop.f32.mrb[8].mxu1 }
 0x63e   : > { %v1185_v28 = vadd.f32 %v1399_v27, %v1183_v22  ;;  %v1173_v29 = vpop.f32.mrb[9].mxu1 }
 0x63f   : > { %v1184_v30 = vadd.f32 %v1182_v26, %v1173_v29 }
 0x640   : > { %v1305_v31 = vmul.f32 -1.442695, %v1185_v28 }
 0x641   : > { %v1304_v32 = vmul.f32 -1.442695, %v1184_v30 }
 0x642   : > { %1476 = vpow2.f32 %v1305_v31 }
 0x643   : > { %1478 = vpow2.f32 %v1304_v32 }
 0x64c   : > { %v1477_v33 = vpop.eup %1476 }
 0x64d   : > { %v1479_v34 = vpop.eup %1478  ;;  %v1193_v35 = vadd.f32 1.0, %v1477_v33 }
 0x64e   : > { %v1192_v36 = vadd.f32 1.0, %v1479_v34 }
 0x64f   : > { %1480 = vrcp.f32 %v1193_v35 }
 0x650   : > { %1482 = vrcp.f32 %v1192_v36 }
 0x659   : > { %v1481_v24 = vpop.eup %1480 }
 0x65a   : > { %v1483_v25 = vpop.eup %1482  ;;  %v1199_v37 = vmul.f32 %v1481_v24, %v1185_v28 }
 0x65b   : > { %v1198_v38 = vmul.f32 %v1483_v25, %v1184_v30 }
 0x65c   : > { %1201 = vst.msk [vmem:[%s377_s16 + $0x8] sm:$0xff] %vm512_vm2, %v1199_v37 }
 0x65d   : > { %1200 = vst.msk [vmem:[%s377_s16] sm:$0xff] %vm512_vm2, %v1198_v38 }
 0x65e   : > { %1497 = shalt.err (!%p1494_p3)
}
 0x65f   : > { %s1498_s14 = scalar_lea.hbm %s1761_s30, 256  ;;  %s1502_s24 = scalar_lea.hbm %s1819_s11, 512 }
 0x660   : > { %p1499_p4 = scmp.ne.s32.totalorder %s1761_s30, %s1498_s14  ;;  %p1503_p9 = scmp.lt.u32.totalorder %s1761_s30, %s1819_s11 }
 0x661   : > { %p1504_p10 = scmp.lt.u32.totalorder %s1502_s24, %s1498_s14  ;;  %p1506_p12 = scmp.lt.u32.totalorder %s1498_s14, %s1761_s30 }
 0x662   : > { %p1500_p7 = pnand %p1499_p4, %p1657_p5 }
 0x663   : > { %p1505_p11 = por %p1504_p10, %p1503_p9 }
 0x664   : > { %p1501_p8 = pneg %p1500_p7 }
 0x665   : > { %p1507_p13 = por %p1506_p12, %p1505_p11 }
 0x667   : > { %p1508_p0 = pnand %p1507_p13, %p1501_p8 }
 0x669   : > { %1511 = shalt.err (!%p1508_p0)
}
 0x66a   : > { %s1557_s21 = smov 128   ;;  %s1558_s13 = smov 8  }
 0x66b   : > { %1418 = dma.vmem_to_hbm [thread:$0]  (%p1657_p5), %s1763_s22, 256, %s1761_s30, %s1767_s12, %s1557_s21, %s1557_s21, %s1558_s13  }
 0x66c PF: > { %p1424_p1 = scmp.ge.s32.totalorder %s1546_s20, 2  ;;  %s1231_s19 = sand.u32 1, %s1534_s17  }
 0x66d   : > { %s1232_s26 = scalar_lea.sflag [#allocation3], %s1231_s19 }
 0x66e   : > { %p1421_p2 = pnand %p1424_p1, %p1661_p6 }
 0x670   : > { %1529 = dma.done.wait (!%p1421_p2), %s1232_s26, 256  }
 0x671   : > { %1531 = vsyncadd (!%p1421_p2), %s1232_s26, 4294967040  ;;  %s1825_s14 = sld [smem:[#allocation5_spill]]  ;;  %s1826_s19 = sld [smem:[#allocation6_spill]] }
 0x672   : > { %p21_p3 = scmp.ge.s32.totalorder %s1644_s23, 4   ;;  %s1827_s17 = smov %s1538_s18 }
 0x673   : > { %s1829_s20 = smov %s1644_s23 }
 0x674   :  { %23 = sbr.rel (!%p21_p3) target bundleno = 3 (0x3), region = 99 }
 0x677   : > { %s1828_s18 = smov %s1825_s14 }
 0x67b   :  { %1237 = vsyncpa [#allocation3], 1 }
 0x67c   :  { %1239 = vsyncpa [#allocation3 + $0x1], 1 }

</bundles_post_ra>
